<compile_context>
chip_gen: v7x
topology: tpu7x:2x2x1
jax: 0.10.0
libtpu: 0.0.40
codegen_flags: <defaults>
</compile_context>

<pallas_src>
import functools

import jax
import jax.numpy as jnp
from jax.experimental import pallas as pl
from jax.experimental.pallas import tpu as pltpu


def _round_up(x, m):
    return ((x + m - 1) // m) * m


def _gem_kernel(x_ref, o_ref, acc_ref, *, eps, inv_hw, hw, thw, need_mask):
    j = pl.program_id(1)
    nj = pl.num_programs(1)

    @pl.when(j == 0)
    def _init():
        acc_ref[...] = jnp.zeros_like(acc_ref)

    # Upcast in-kernel: bf16 inputs stay 2 bytes/elem on the HBM/DMA side,
    # accumulation is always f32.
    x = x_ref[...].astype(jnp.float32)          # (TB, C, THW)
    xc = jnp.maximum(x, eps)                    # clamp(min=eps)
    x3 = xc * xc * xc                           # pow(3)

    if need_mask:
        # Only the LAST hw tile is partial; keep full tiles on the cheap path
        # (no per-element iota / compare / select).
        @pl.when(j < nj - 1)
        def _acc_full():
            acc_ref[...] += jnp.sum(x3, axis=-1)

        @pl.when(j == nj - 1)
        def _acc_tail():
            pos = j * thw + jax.lax.broadcasted_iota(jnp.int32, x3.shape, 2)
            acc_ref[...] += jnp.sum(jnp.where(pos < hw, x3, 0.0), axis=-1)
    else:
        acc_ref[...] += jnp.sum(x3, axis=-1)

    @pl.when(j == nj - 1)
    def _finalize():
        mean = acc_ref[...] * inv_hw            # avg_pool2d over full (H, W)
        # mean >= eps**3 > 0, so log/exp is safe; this is pow(1/3).
        out = jnp.exp(jnp.log(mean) * (1.0 / 3.0))
        o_ref[...] = out.astype(o_ref.dtype)


def _vmem_capacity_bytes():
    try:
        info = pltpu.get_tpu_info()
        cap = int(getattr(info, "vmem_capacity_bytes", 0))
        if cap > 0:
            return cap
    except Exception:
        pass
    return 64 * 1024 * 1024     # conservative fallback (v7x per-TC VMEM)


def _legal_batch_tiles(n):
    """Batch-tile sizes keeping the (tb, C) output block layout-legal:
    tb is a multiple of 8, or tb == N (full dim).  Returned descending."""
    vals = list(range((n // 8) * 8, 0, -8))
    if n not in vals:
        vals = [n] + vals
    return vals


def gem_pool(x, eps=1e-6, *, vmem_block_budget_bytes=None):
    """GeM pooling with fixed p=3.  x: (N, C, H, W) -> (N, C, 1, 1)."""
    N, C, H, W = x.shape
    hw = H * W
    x_flat = x.reshape(N, C, hw)
    itemsize = jnp.dtype(x.dtype).itemsize

    vmem_cap = _vmem_capacity_bytes()
    if vmem_block_budget_bytes is None:
        # Bigger blocks on 128 MiB-VMEM chips (v5e/v6e), smaller on v7x.
        vmem_block_budget_bytes = vmem_cap // 8
    budget = max(1, int(min(vmem_block_budget_bytes, vmem_cap // 4)))

    # Real (padded) VMEM footprint of a (tb, C, thw) block: lane dim padded to
    # 128, sublane (C) dim padded to the dtype packing unit.
    sub = 8 * max(1, 4 // itemsize)             # 8 (f32), 16 (bf16), 32 (i8)
    c_pad = _round_up(C, sub)

    def padded_block_bytes(tb, thw):
        return tb * c_pad * _round_up(thw, 128) * itemsize

    # ---- Pick batch tile TB and hw (reduction) tile THW --------------------
    candidates = _legal_batch_tiles(N)          # descending, layout-legal
    fitting = [t for t in candidates if padded_block_bytes(t, hw) <= budget]

    if fitting:
        # Whole spatial extent per step (single contiguous DMA per batch row).
        thw = hw
        # Prefer >= 2 steps on the parallel batch axis (v7x has 2 TCs), as
        # long as the tile stays layout-legal (multiple of 8 or == N).
        split = [t for t in fitting if pl.cdiv(N, t) >= 2]
        tb = split[0] if split else fitting[0]
    else:
        # Large feature map: smallest legal batch tile, tile the reduction
        # axis in multiples of 128 (kept large for chunky DMA segments).
        tb = candidates[-1]
        thw = (budget // max(1, tb * c_pad * itemsize)) // 128 * 128
        thw = max(thw, 128)
        if hw >= 128:
            thw = min(thw, (hw // 128) * 128)
        if thw >= hw:
            thw = hw

    need_mask = (hw % thw) != 0
    grid = (pl.cdiv(N, tb), pl.cdiv(hw, thw))

    # ---- VMEM limit from PADDED shapes: double-buffered input + output
    #      blocks, f32 accumulator scratch, plus compiler headroom. ----------
    blk_in = padded_block_bytes(tb, thw)
    out_blk = _round_up(tb, 8) * _round_up(C, 128) * itemsize
    acc_blk = _round_up(tb, 8) * _round_up(C, 128) * 4
    need = 2 * blk_in + 2 * out_blk + acc_blk + (2 << 20)
    vmem_limit = int(min(max(need, 16 << 20), vmem_cap - (4 << 20)))

    kernel = functools.partial(
        _gem_kernel,
        eps=float(eps),
        inv_hw=float(1.0 / hw),
        hw=int(hw),
        thw=int(thw),
        need_mask=bool(need_mask),
    )

    # Note: when N % tb != 0 the last batch block reads OOB-padded rows; their
    # garbage accumulations are discarded by the masked output writeback.
    out = pl.pallas_call(
        kernel,
        out_shape=jax.ShapeDtypeStruct((N, C), x.dtype),
        grid_spec=pltpu.PrefetchScalarGridSpec(
            num_scalar_prefetch=0,
            grid=grid,
            in_specs=[pl.BlockSpec((tb, C, thw), lambda n, j: (n, 0, j))],
            out_specs=pl.BlockSpec((tb, C), lambda n, j: (n, 0)),
            scratch_shapes=[pltpu.VMEM((tb, C), jnp.float32)],
        ),
        compiler_params=pltpu.CompilerParams(
            dimension_semantics=("parallel", "arbitrary"),
            vmem_limit_bytes=vmem_limit,
        ),
    )(x_flat)

    return out.reshape(N, C, 1, 1)


def gem_ref(x, eps=1e-6):
    xc = jnp.maximum(x.astype(jnp.float32), eps) ** 3
    return jnp.mean(xc, axis=(-2, -1), keepdims=True) ** (1.0 / 3.0)


if __name__ == "__main__":
    key = jax.random.PRNGKey(0)

    # Primary test: shapes implied by the module (small NCHW input).
    x = jax.random.normal(key, (2, 4, 16, 16), dtype=jnp.float32)
    out = gem_pool(x)
    jax.block_until_ready(out)
    ref = gem_ref(x)
    assert out.shape == (2, 4, 1, 1), out.shape
    assert jnp.allclose(out, ref.astype(out.dtype), atol=1e-5, rtol=1e-5)

    # Batched path: N=16 -> tb=8, parallel batch axis gets 2 steps; hw == full.
    k2 = jax.random.PRNGKey(1)
    x2 = jax.random.normal(k2, (16, 8, 7, 7), dtype=jnp.float32)
    out2 = gem_pool(x2)
    jax.block_until_ready(out2)
    assert jnp.allclose(out2, gem_ref(x2).astype(out2.dtype), atol=1e-5, rtol=1e-5)

    # hw-reduction tiling + tail masking on the LAST tile only (tiny budget).
    k3 = jax.random.PRNGKey(2)
    x3 = jax.random.normal(k3, (2, 8, 60, 60), dtype=jnp.float32)
    out3 = gem_pool(x3, vmem_block_budget_bytes=64 * 1024)
    jax.block_until_ready(out3)
    assert jnp.allclose(out3, gem_ref(x3).astype(out3.dtype), atol=1e-5, rtol=1e-5)

    # bf16 inputs: checks the 16-row sublane packing path and lane-dense out.
    k4 = jax.random.PRNGKey(3)
    x4 = jax.random.normal(k4, (16, 256, 7, 7), dtype=jnp.bfloat16)
    out4 = gem_pool(x4)
    jax.block_until_ready(out4)
    assert jnp.allclose(out4.astype(jnp.float32),
                        gem_ref(x4).astype(jnp.bfloat16).astype(jnp.float32),
                        atol=2e-2, rtol=2e-2)

    print("KERNEL_OK")
</pallas_src>

<mosaic_0001>
module attributes {stable_mosaic.version = 11 : i64} {
  func.func @_gem_kernel(%arg0: i32, %arg1: i32, %arg2: memref<2x4x256xf32, #tpu.memory_space<vmem>>, %arg3: memref<2x4xf32, #tpu.memory_space<vmem>>, %arg4: memref<2x4xf32, #tpu.memory_space<vmem>>) attributes {dimension_semantics = [#tpu.dimension_semantics<parallel>, #tpu.dimension_semantics<arbitrary>], iteration_bounds = array<i64: 1, 1>, scalar_prefetch = 0 : i64, scratch_operands = 1 : i64, tpu.core_type = #tpu.core_type<tc>, window_params = [{transform_indices = @transform_0, window_bounds = array<i64: 2, 4, 256>}, {transform_indices = @transform_1, window_bounds = array<i64: 2, 4>}]} {
    %c0_i32 = arith.constant 0 : i32
    %0 = arith.cmpi eq, %arg1, %c0_i32 : i32
    %1 = arith.extui %0 : i1 to i32
    %c0_i32_0 = arith.constant 0 : i32
    %2 = arith.cmpi ne, %1, %c0_i32_0 : i32
    scf.if %2 {
      %cst_10 = arith.constant 0.000000e+00 : f32
      %15 = vector.broadcast %cst_10 : f32 to vector<2x4xf32>
      %c0_11 = arith.constant 0 : index
      %c0_12 = arith.constant 0 : index
      %16 = vector.load %arg4[%c0_11, %c0_12] : memref<2x4xf32, #tpu.memory_space<vmem>>, vector<2x4xf32>
      tpu.vector_store %arg4[%c0_11, %c0_12], %15 {strides = array<i32>} : memref<2x4xf32, #tpu.memory_space<vmem>>, vector<2x4xf32>,
    } else {
    }
    %c0 = arith.constant 0 : index
    %c0_1 = arith.constant 0 : index
    %c0_2 = arith.constant 0 : index
    %3 = vector.load %arg2[%c0, %c0_1, %c0_2] : memref<2x4x256xf32, #tpu.memory_space<vmem>>, vector<2x4x256xf32>
    %cst = arith.constant 9.99999997E-7 : f32
    %4 = vector.broadcast %cst : f32 to vector<2x4x256xf32>
    %5 = arith.maximumf %3, %4 : vector<2x4x256xf32>
    %6 = arith.mulf %5, %5 : vector<2x4x256xf32>
    %7 = arith.mulf %6, %5 : vector<2x4x256xf32>
    %c0_3 = arith.constant 0 : index
    %c0_4 = arith.constant 0 : index
    %8 = vector.load %arg4[%c0_3, %c0_4] : memref<2x4xf32, #tpu.memory_space<vmem>>, vector<2x4xf32>
    %cst_5 = arith.constant dense<0.000000e+00> : vector<2x4xf32>
    %9 = vector.multi_reduction <add>, %7, %cst_5 [2] : vector<2x4x256xf32> to vector<2x4xf32>
    %10 = arith.addf %8, %9 : vector<2x4xf32>
    %c0_6 = arith.constant 0 : index
    %c0_7 = arith.constant 0 : index
    %11 = vector.load %arg4[%c0_6, %c0_7] : memref<2x4xf32, #tpu.memory_space<vmem>>, vector<2x4xf32>
    tpu.vector_store %arg4[%c0_6, %c0_7], %10 {strides = array<i32>} : memref<2x4xf32, #tpu.memory_space<vmem>>, vector<2x4xf32>,
    %c0_i32_8 = arith.constant 0 : i32
    %12 = arith.cmpi eq, %arg1, %c0_i32_8 : i32
    %13 = arith.extui %12 : i1 to i32
    %c0_i32_9 = arith.constant 0 : i32
    %14 = arith.cmpi ne, %13, %c0_i32_9 : i32
    scf.if %14 {
      %c0_10 = arith.constant 0 : index
      %c0_11 = arith.constant 0 : index
      %15 = vector.load %arg4[%c0_10, %c0_11] : memref<2x4xf32, #tpu.memory_space<vmem>>, vector<2x4xf32>
      %cst_12 = arith.constant 3.906250e-03 : f32
      %16 = vector.broadcast %cst_12 : f32 to vector<2x4xf32>
      %17 = arith.mulf %15, %16 : vector<2x4xf32>
      %18 = math.log %17 : vector<2x4xf32>
      %cst_13 = arith.constant 0.333333343 : f32
      %19 = vector.broadcast %cst_13 : f32 to vector<2x4xf32>
      %20 = arith.mulf %18, %19 : vector<2x4xf32>
      %21 = math.exp %20 : vector<2x4xf32>
      %c0_14 = arith.constant 0 : index
      %c0_15 = arith.constant 0 : index
      %22 = vector.load %arg3[%c0_14, %c0_15] : memref<2x4xf32, #tpu.memory_space<vmem>>, vector<2x4xf32>
      tpu.vector_store %arg3[%c0_14, %c0_15], %21 {strides = array<i32>} : memref<2x4xf32, #tpu.memory_space<vmem>>, vector<2x4xf32>,
    } else {
    }
    return
  }
  func.func @transform_0(%arg0: i32, %arg1: i32) -> (i32, i32, i32) {
    %c0_i32 = arith.constant 0 : i32
    %c0_i32_0 = arith.constant 0 : i32
    return %arg0, %c0_i32, %arg1 : i32, i32, i32
  }
  func.func @transform_1(%arg0: i32, %arg1: i32) -> (i32, i32) {
    %c0_i32 = arith.constant 0 : i32
    %c0_i32_0 = arith.constant 0 : i32
    return %arg0, %c0_i32 : i32, i32
  }
}

</mosaic_0001>

<bundles_post_ra>
// kernel: tpu_custom_call.1
= control target key start
LH: loop header
LB: loop body
LE: loop exit
PB: predicated region body
PF: predicated region fallthrough
CT: control target
= control target key end

     0   :  { %6 = vsyncpa [#allocation4], 0  ;;  %s198_s0 = inlined_call_operand.hbm [shape: f32[2,4,256], index: 0, kind: input, shape index: {}]   ;;  %s199_s1 = inlined_call_operand.hbm [shape: f32[2,4], index: 1, kind: output, shape index: {}]  }
   0x1   :  { %7 = vsyncpa [#allocation5], 0  ;;  %s156_s6 = smov [#allocation3]   ;;  %s108_s10 = scalar_lea.hbm %s198_s0, 256 }
   0x2   :  { %s13_s7 = sshll.u32 %s156_s6, 4  ;;  %p109_p0 = scmp.ne.s32.totalorder %s198_s0, %s108_s10  ;;  %s14_s7 = int_to_ptr.vmem [resolvable:$true] %s13_s7 }
   0x3   :  { %p112_p1 = scmp.lt.u32.totalorder %s108_s10, %s198_s0 }
   0x5   :  { %p114_p2 = pnand %p112_p1, %p109_p0 }
   0x7   :  { %117 = shalt.err (!%p114_p2)
}
   0x8   :  { %s118_s15 = scalar_lea.vmem %s14_s7, 256  ;;  %p123_p4 = scmp.lt.s32.totalorder %s14_s7, %s14_s7 }
   0x9   :  { %p119_p3 = scmp.ne.s32.totalorder %s14_s7, %s118_s15  ;;  %p124_p5 = scmp.lt.s32.totalorder %s118_s15, %s118_s15 }
   0xb   :  { %p125_p6 = por %p124_p5, %p123_p4 }
   0xd   :  { %p126_p7 = pnand %p125_p6, %p119_p3 }
   0xf   :  { %129 = shalt.err (!%p126_p7)
}
  0x10   :  { %s157_s16 = smov 128   ;;  %s158_s17 = smov 8  }
  0x11   :  { %19 = dma.hbm_to_vmem [thread:$0]  %s198_s0, 256, %s14_s7, [#allocation4], %s157_s16, %s157_s16, %s158_s17  }
  0x12   :  { %152 = dma.done.wait [#allocation4], 256  }
  0x13   :  { %153 = vsyncadd [#allocation4], 4294967040  ;;  %v29_v0 = vld [vmem:[#allocation3] sm:$0xff]  ;;  %v30_v1 = vld [vmem:[#allocation3 + $0x8] sm:$0xff]  ;;  %vm44_vm0 = vcmask 1043456   ;;  %vm27_vm1 = vcmask 25600   ;;  %v57_v17 = vlaneseq }
  0x14   :  { %v31_v2 = vmax.f32 %v29_v0, 1e-06  ;;  %v32_v3 = vmax.f32 %v30_v1, 1e-06  ;;  %v159_v16 = vmov 0.0   ;;  %vm67_vm2 = vcmask 1041409  }
  0x15   :  { %28 = vst.msk [vmem:[#allocation2] sm:$0x3] %vm27_vm1, %v159_v16  ;;  %v58_v18 = vand.u32 127, %v57_v17  ;;  %v60_v19 = vshrl.u32 %v57_v17, 7  ;;  %s160_s0 = smov [#allocation6]  }
  0x16   :  { %v33_v4 = vmul.f32 %v31_v2, %v31_v2  ;;  %v34_v5 = vmul.f32 %v32_v3, %v32_v3  ;;  %s90_s20 = sshll.u32 %s160_s0, 4  ;;  %s91_s20 = int_to_ptr.vmem [resolvable:$true] %s90_s20 }
  0x17   :  { %v61_v21 = vsub.s32 %v58_v18, %v60_v19  ;;  %s130_s21 = scalar_lea.vmem %s91_s20, 32  ;;  %p135_p9 = scmp.lt.s32.totalorder %s91_s20, %s91_s20 }
  0x18   :  { %v35_v6 = vmul.f32 %v33_v4, %v31_v2  ;;  %v36_v7 = vmul.f32 %v34_v5, %v32_v3  ;;  %p131_p8 = scmp.ne.s32.totalorder %s91_s20, %s130_s21  ;;  %p136_p10 = scmp.lt.s32.totalorder %s130_s21, %s130_s21 }
  0x1a   :  { %v40_v8 = vcombine.high %v35_v6, %v35_v6  ;;  %v45_v9 = vsel %vm44_vm0, %v35_v6, 0.0  ;;  %v41_v10 = vcombine.high %v36_v7, %v36_v7  ;;  %v50_v12 = vsel %vm44_vm0, %v36_v7, 0.0  ;;  %p137_p11 = por %p136_p10, %p135_p9 }
  0x1c   :  { %v46_v11 = vsel %vm44_vm0, %v40_v8, 0.0  ;;  %v51_v13 = vsel %vm44_vm0, %v41_v10, 0.0  ;;  %v37_v25 = vld [vmem:[#allocation2] sm:$0x3]  ;;  %p138_p12 = pnand %p137_p11, %p131_p8 }
  0x1d   :  { %v47_v14 = vadd.f32 %v46_v11, %v45_v9  ;;  %v52_v15 = vadd.f32 %v51_v13, %v50_v12 }
  0x1f   :  { %48 = vadd.xlane.f32.xlu0 %v47_v14 }
  0x23   :  { %53 = vadd.xlane.f32.xlu0 %v52_v15 }
  0xac   :  { %v49_v20 = vpop.xlane.xlu0 %48 }
  0xad   :  { %v62_v23 = vrot.slane %v49_v20, %v61_v21 }
  0xb0   :  { %v54_v22 = vpop.xlane.xlu0 %53 }
  0xb1   :  { %v66_v24 = vrot.slane %v54_v22, %v61_v21 }
  0xb3   :  { %v68_v26 = vsel %vm67_vm2, %v66_v24, %v62_v23 }
  0xb4   :  { %v70_v27 = vadd.f32 %v68_v26, %v37_v25 }
  0xb6   :  { %72 = vst.msk [vmem:[#allocation2] sm:$0x3] %vm27_vm1, %v70_v27 }
  0xbd   :  { %v76_v28 = vld [vmem:[#allocation2] sm:$0x3] }
  0xbe   :  { %v77_v29 = vmul.f32 0.00390625, %v76_v28 }
  0xc0   :  { %104 = vlog2.f32 %v77_v29 }
  0xca   :  { %v105_v30 = vpop.eup %104 }
  0xcb   :  { %v79_v31 = vmul.f32 0.6931472, %v105_v30 }
  0xcd   :  { %v80_v32 = vmul.f32 0.33333334, %v79_v31 }
  0xcf   :  { %v81_v33 = vmul.f32 1.442695, %v80_v32 }
  0xd1   :  { %106 = vpow2.f32 %v81_v33 }
  0xdb   :  { %v107_v34 = vpop.eup %106 }
  0xdc   :  { %83 = vst.msk [vmem:[#allocation6] sm:$0x3] %vm27_vm1, %v107_v34 }
  0xdd   :  { %141 = shalt.err (!%p138_p12)
}
  0xde   :  { %s142_s24 = scalar_lea.hbm %s199_s1, 32 }
  0xdf   :  { %p143_p13 = scmp.ne.s32.totalorder %s199_s1, %s142_s24  ;;  %p146_p0 = scmp.lt.u32.totalorder %s142_s24, %s199_s1 }
  0xe1   :  { %p148_p1 = pnand %p146_p0, %p143_p13 }
  0xe3   :  { %151 = shalt.err (!%p148_p1)
}
  0xe4   :  { %93 = dma.vmem_to_hbm [thread:$0]  %s91_s20, 32, %s199_s1, [#allocation5]  }
  0xe5   :  { %154 = dma.done.wait [#allocation5], 32  }
  0xe6   :  { %155 = vsyncadd [#allocation5], 4294967264 }
  0xe7   :  { %97 = vsyncpa [#allocation4], 1 }
  0xe8   :  { %98 = vsyncpa [#allocation5], 1 }

</bundles_post_ra>
